<compile_context>
chip_gen: v7x
topology: tpu7x:2x2x1
jax: 0.10.0
libtpu: 0.0.40
codegen_flags: <defaults>
</compile_context>

<pallas_src>
import functools

import jax
import jax.numpy as jnp
from jax.experimental import pallas as pl
from jax.experimental.pallas import tpu as pltpu

OBS_DIM = 128 + 5 + 3        # 136
FORCE_DIM = 5 + 3            # 8
HIDDEN = 128
NUM_OUTPUTS = 4              # "num_outputs" of the RLlib model (small example)
PACK_DIM = 8                 # lanes 0:4 = logits, lane 4 = value, 5:8 = zero
LEAKY_SLOPE = 0.01           # PyTorch nn.LeakyReLU default
MAX_TILE_B = 2048            # batch tile (rows per grid step)
VMEM_LIMIT_BYTES = 48 * 1024 * 1024


# ---------------------------------------------------------------------------
# Kernel
# ---------------------------------------------------------------------------
def policy_kernel(
    x_ref,                                  # (TB, 136) f32 raw features
    # mlp_f (first pair fused): Linear(8,128), Tanh, Linear(128,128), Tanh, Linear(128,128)
    wf01, bf01, wf2, bf2, wf3, bf3,
    # fused+packed first layers of mlp_aev and values: (136, 256) split at K=128
    wav_t, wav_b, bav,
    # mlp_aev tail: LeakyReLU, Linear(128,128), LeakyReLU
    wa2, ba2,
    # mlp_interaction: Linear(128,128), Tanh, Linear(128,128), Tanh, Linear(128,4)->packed
    wi0, bi0, wi1, bi1,
    # packed logits head (lanes 0:4), packed bias (lane 4 holds bv2), wv2 as a row
    wi2p, bp, wv2r,
    # output: (TB, 8) slab
    out_ref,
    *, bf16_tanh,
):
    # Split the raw feature block at the 128-lane tile boundary.
    x128 = x_ref[:, :HIDDEN]                # (TB, 128) f32
    x8 = x_ref[:, HIDDEN:OBS_DIM]           # (TB, 8)   f32

    def dot(a, w_ref):
        return jnp.dot(
            a.astype(jnp.bfloat16), w_ref[...],
            preferred_element_type=jnp.float32,
        )

    def tanh(h):
        # bf16 EUP path on v6e/v7x; f32 on v2-v5 (no bf16 EUP there).
        if bf16_tanh:
            h = h.astype(jnp.bfloat16)
        return jnp.tanh(h)

    def leaky(h):
        return jnp.maximum(h, LEAKY_SLOPE * h)

    # --- mlp_f (force-feature branch; first Linear pair fused offline) ---
    f = dot(x8, wf01) + bf01[...]
    f = tanh(f)
    f = dot(f, wf2) + bf2[...]
    f = tanh(f)
    f = dot(f, wf3) + bf3[...]

    # --- fused first layers of mlp_aev (lanes 0:128) and values (lanes 128:256) ---
    av = dot(x128, wav_t) + dot(x8, wav_b) + bav[...]       # (TB, 256) f32

    # --- mlp_aev tail ---
    a = leaky(av[:, :HIDDEN])
    a = dot(a, wa2) + ba2[...]
    a = leaky(a)

    out = a + f                                             # residual add

    # --- mlp_interaction ---
    h = tanh(dot(out, wi0) + bi0[...])
    h = tanh(dot(h, wi1) + bi1[...])

    # --- value head tail: Tanh then Linear(128,1) done on VPU/XLU ---
    vh = tanh(av[:, HIDDEN:])                               # (TB, 128)
    value = jnp.sum(vh.astype(jnp.float32) * wv2r[...],
                    axis=-1, keepdims=True)                 # (TB, 1) f32

    # --- packed, lane-dense final store: logits lanes 0:4, value lane 4 ---
    packed = dot(h, wi2p) + bp[...]                         # (TB, 8) f32
    lane = jax.lax.broadcasted_iota(jnp.int32, packed.shape, 1)
    packed = packed + jnp.where(lane == NUM_OUTPUTS, value, 0.0)
    out_ref[...] = packed.astype(out_ref.dtype)


# ---------------------------------------------------------------------------
# Wrapper
# ---------------------------------------------------------------------------
def _round_up(x, m):
    return ((x + m - 1) // m) * m


def _cdiv(a, b):
    return (a + b - 1) // b


@functools.lru_cache(maxsize=None)
def _bf16_tanh_ok():
    try:
        kind = jax.devices()[0].device_kind.lower()
    except Exception:
        return True
    # v2-v5 EUPs have no bf16 path; keep f32 tanh there.
    return not any(v in kind for v in ("v2", "v3", "v4", "v5"))


@functools.partial(jax.jit, static_argnames=("bf16_tanh",))
def _policy_forward(features, prep_params, *, bf16_tanh):
    B = features.shape[0]
    # At least 2 grid tiles when possible so both v7x TensorCores get work.
    tb = max(8, min(MAX_TILE_B, _round_up(_cdiv(B, 2), 8)))
    num_tiles = _cdiv(B, tb)

    in_specs = [pl.BlockSpec((tb, OBS_DIM), lambda i: (i, 0))] + [
        pl.BlockSpec(p.shape, lambda i: (0, 0)) for p in prep_params
    ]
    out_shape = jax.ShapeDtypeStruct((B, PACK_DIM), jnp.float32)
    out_specs = pl.BlockSpec((tb, PACK_DIM), lambda i: (i, 0))

    packed = pl.pallas_call(
        functools.partial(policy_kernel, bf16_tanh=bf16_tanh),
        out_shape=out_shape,
        grid_spec=pltpu.PrefetchScalarGridSpec(
            num_scalar_prefetch=0,
            grid=(num_tiles,),
            in_specs=in_specs,
            out_specs=out_specs,
        ),
        compiler_params=pltpu.CompilerParams(
            dimension_semantics=("parallel",),
            vmem_limit_bytes=VMEM_LIMIT_BYTES,
        ),
    )(features, *prep_params)

    logits = packed[:, :NUM_OUTPUTS]
    value = packed[:, NUM_OUTPUTS:NUM_OUTPUTS + 1]
    return logits, value


def policy_forward(features, prep_params):
    """features: (B, 136) f32.  prep_params: output of preprocess_params().
    Returns (logits (B, NUM_OUTPUTS) f32, value (B, 1) f32)."""
    return _policy_forward(features, prep_params, bf16_tanh=_bf16_tanh_ok())


# ---------------------------------------------------------------------------
# Parameter preprocessing: fuse Linear pairs, pack heads, cast weights to bf16
# ---------------------------------------------------------------------------
def preprocess_params(raw):
    (wf0, bf0, wf1, bf1, wf2, bf2, wf3, bf3,
     wa0, ba0, wa1, ba1, wa2, ba2,
     wi0, bi0, wi1, bi1, wi2, bi2,
     wv0, bv0, wv1, bv1, wv2, bv2) = raw

    # Fuse consecutive Linear layers with no nonlinearity between them.
    wf01 = wf0 @ wf1
    bf01 = bf0 @ wf1 + bf1
    wa01 = wa0 @ wa1
    ba01 = ba0 @ wa1 + ba1
    wv01 = wv0 @ wv1
    bv01 = bv0 @ wv1 + bv1

    # Pack aev / value first (fused) layers along N -> (136, 256); split the
    # K dimension into the 128-wide aev part and the 8-wide force part.
    wav = jnp.concatenate([wa01, wv01], axis=1)       # (136, 256)
    bav = jnp.concatenate([ba01, bv01], axis=1)       # (1, 256)
    wav_t = wav[:HIDDEN]                              # (128, 256)
    wav_b = wav[HIDDEN:]                              # (8, 256)

    # Logits head packed into an 8-lane slab (lanes 0:4); value-head bias in
    # lane 4.  The value-head weight becomes a row for the VPU/XLU reduction.
    wi2p = jnp.zeros((HIDDEN, PACK_DIM), jnp.float32).at[:, :NUM_OUTPUTS].set(wi2)
    bp = jnp.zeros((1, PACK_DIM), jnp.float32)
    bp = bp.at[:, :NUM_OUTPUTS].set(bi2)
    bp = bp.at[:, NUM_OUTPUTS:NUM_OUTPUTS + 1].set(bv2)
    wv2r = wv2.T.astype(jnp.float32)                  # (1, 128)

    bf16 = lambda w: w.astype(jnp.bfloat16)
    return (
        bf16(wf01), bf01, bf16(wf2), bf2, bf16(wf3), bf3,
        bf16(wav_t), bf16(wav_b), bav,
        bf16(wa2), ba2,
        bf16(wi0), bi0, bf16(wi1), bi1,
        bf16(wi2p), bp, wv2r,
    )


# ---------------------------------------------------------------------------
# Deterministic parameter construction (weights stored as (in, out))
# ---------------------------------------------------------------------------
def make_params(key):
    def linear(key, fan_in, fan_out):
        kw, kb = jax.random.split(key)
        # uniform(-1/sqrt(fan_in), 1/sqrt(fan_in)) like torch.nn.Linear default
        bound = 1.0 / jnp.sqrt(float(fan_in))
        w = jax.random.uniform(kw, (fan_in, fan_out), jnp.float32, -bound, bound)
        b = jax.random.uniform(kb, (1, fan_out), jnp.float32, -bound, bound)
        return w, b

    dims = [
        # mlp_f
        (FORCE_DIM, HIDDEN), (HIDDEN, HIDDEN), (HIDDEN, HIDDEN), (HIDDEN, HIDDEN),
        # mlp_aev
        (OBS_DIM, HIDDEN), (HIDDEN, HIDDEN), (HIDDEN, HIDDEN),
        # mlp_interaction
        (HIDDEN, HIDDEN), (HIDDEN, HIDDEN), (HIDDEN, NUM_OUTPUTS),
        # values
        (OBS_DIM, HIDDEN), (HIDDEN, HIDDEN), (HIDDEN, 1),
    ]
    keys = jax.random.split(key, len(dims))
    params = []
    for k, (fi, fo) in zip(keys, dims):
        w, b = linear(k, fi, fo)
        params.extend([w, b])
    return params


# ---------------------------------------------------------------------------
# Pure-JAX reference (unfused, f32) for a sanity check
# ---------------------------------------------------------------------------
def reference_forward(features, params):
    (wf0, bf0, wf1, bf1, wf2, bf2, wf3, bf3,
     wa0, ba0, wa1, ba1, wa2, ba2,
     wi0, bi0, wi1, bi1, wi2, bi2,
     wv0, bv0, wv1, bv1, wv2, bv2) = params

    x = features
    x8 = x[:, -FORCE_DIM:]
    leaky = lambda h: jnp.where(h > 0, h, LEAKY_SLOPE * h)

    f = x8 @ wf0 + bf0
    f = f @ wf1 + bf1
    f = jnp.tanh(f)
    f = f @ wf2 + bf2
    f = jnp.tanh(f)
    f = f @ wf3 + bf3

    a = x @ wa0 + ba0
    a = a @ wa1 + ba1
    a = leaky(a)
    a = a @ wa2 + ba2
    a = leaky(a)

    out = a + f
    h = jnp.tanh(out @ wi0 + bi0)
    h = jnp.tanh(h @ wi1 + bi1)
    logits = h @ wi2 + bi2

    v = x @ wv0 + bv0
    v = v @ wv1 + bv1
    v = jnp.tanh(v)
    v = v @ wv2 + bv2
    return logits, v


if __name__ == "__main__":
    key = jax.random.PRNGKey(0)
    k_feat, k_params = jax.random.split(key)

    raw_params = make_params(k_params)
    prep_params = preprocess_params(raw_params)

    # Small batch (single tile) and a larger batch (2 tiles + ragged tail block).
    for B in (8, 500):
        kf = jax.random.fold_in(k_feat, B)
        features = jax.random.normal(kf, (B, OBS_DIM), jnp.float32)

        logits, value = policy_forward(features, prep_params)
        jax.block_until_ready((logits, value))

        ref_logits, ref_value = reference_forward(features, raw_params)
        assert logits.shape == (B, NUM_OUTPUTS)
        assert value.shape == (B, 1)
        # bf16 matmuls + offline fusion -> relaxed tolerance vs. f32 reference.
        assert jnp.allclose(logits, ref_logits, atol=5e-2, rtol=5e-2)
        assert jnp.allclose(value, ref_value, atol=5e-2, rtol=5e-2)

    print("KERNEL_OK")
</pallas_src>

<mosaic_0001>
module attributes {stable_mosaic.version = 11 : i64} {
  func.func @policy_kernel(%arg0: i32, %arg1: memref<8x136xf32, #tpu.memory_space<vmem>>, %arg2: memref<8x128xbf16, #tpu.memory_space<vmem>>, %arg3: memref<1x128xf32, #tpu.memory_space<vmem>>, %arg4: memref<128x128xbf16, #tpu.memory_space<vmem>>, %arg5: memref<1x128xf32, #tpu.memory_space<vmem>>, %arg6: memref<128x128xbf16, #tpu.memory_space<vmem>>, %arg7: memref<1x128xf32, #tpu.memory_space<vmem>>, %arg8: memref<128x256xbf16, #tpu.memory_space<vmem>>, %arg9: memref<8x256xbf16, #tpu.memory_space<vmem>>, %arg10: memref<1x256xf32, #tpu.memory_space<vmem>>, %arg11: memref<128x128xbf16, #tpu.memory_space<vmem>>, %arg12: memref<1x128xf32, #tpu.memory_space<vmem>>, %arg13: memref<128x128xbf16, #tpu.memory_space<vmem>>, %arg14: memref<1x128xf32, #tpu.memory_space<vmem>>, %arg15: memref<128x128xbf16, #tpu.memory_space<vmem>>, %arg16: memref<1x128xf32, #tpu.memory_space<vmem>>, %arg17: memref<128x8xbf16, #tpu.memory_space<vmem>>, %arg18: memref<1x8xf32, #tpu.memory_space<vmem>>, %arg19: memref<1x128xf32, #tpu.memory_space<vmem>>, %arg20: memref<8x8xf32, #tpu.memory_space<vmem>>) attributes {dimension_semantics = [#tpu.dimension_semantics<parallel>], iteration_bounds = array<i64: 1>, scalar_prefetch = 0 : i64, scratch_operands = 0 : i64, tpu.core_type = #tpu.core_type<tc>, window_params = [{transform_indices = @transform_0, window_bounds = array<i64: 8, 136>}, {pipeline_mode = #tpu.pipeline_mode<synchronous>, transform_indices = @transform_1, window_bounds = array<i64: 8, 128>}, {pipeline_mode = #tpu.pipeline_mode<synchronous>, transform_indices = @transform_2, window_bounds = array<i64: 1, 128>}, {pipeline_mode = #tpu.pipeline_mode<synchronous>, transform_indices = @transform_3, window_bounds = array<i64: 128, 128>}, {pipeline_mode = #tpu.pipeline_mode<synchronous>, transform_indices = @transform_4, window_bounds = array<i64: 1, 128>}, {pipeline_mode = #tpu.pipeline_mode<synchronous>, transform_indices = @transform_5, window_bounds = array<i64: 128, 128>}, {pipeline_mode = #tpu.pipeline_mode<synchronous>, transform_indices = @transform_6, window_bounds = array<i64: 1, 128>}, {pipeline_mode = #tpu.pipeline_mode<synchronous>, transform_indices = @transform_7, window_bounds = array<i64: 128, 256>}, {pipeline_mode = #tpu.pipeline_mode<synchronous>, transform_indices = @transform_8, window_bounds = array<i64: 8, 256>}, {pipeline_mode = #tpu.pipeline_mode<synchronous>, transform_indices = @transform_9, window_bounds = array<i64: 1, 256>}, {pipeline_mode = #tpu.pipeline_mode<synchronous>, transform_indices = @transform_10, window_bounds = array<i64: 128, 128>}, {pipeline_mode = #tpu.pipeline_mode<synchronous>, transform_indices = @transform_11, window_bounds = array<i64: 1, 128>}, {pipeline_mode = #tpu.pipeline_mode<synchronous>, transform_indices = @transform_12, window_bounds = array<i64: 128, 128>}, {pipeline_mode = #tpu.pipeline_mode<synchronous>, transform_indices = @transform_13, window_bounds = array<i64: 1, 128>}, {pipeline_mode = #tpu.pipeline_mode<synchronous>, transform_indices = @transform_14, window_bounds = array<i64: 128, 128>}, {pipeline_mode = #tpu.pipeline_mode<synchronous>, transform_indices = @transform_15, window_bounds = array<i64: 1, 128>}, {pipeline_mode = #tpu.pipeline_mode<synchronous>, transform_indices = @transform_16, window_bounds = array<i64: 128, 8>}, {pipeline_mode = #tpu.pipeline_mode<synchronous>, transform_indices = @transform_17, window_bounds = array<i64: 1, 8>}, {pipeline_mode = #tpu.pipeline_mode<synchronous>, transform_indices = @transform_18, window_bounds = array<i64: 1, 128>}, {transform_indices = @transform_19, window_bounds = array<i64: 8, 8>}]} {
    %c0 = arith.constant 0 : index
    %c0_0 = arith.constant 0 : index
    %0 = vector.load %arg1[%c0, %c0_0] : memref<8x136xf32, #tpu.memory_space<vmem>>, vector<8x128xf32>
    %c0_1 = arith.constant 0 : index
    %c128 = arith.constant 128 : index
    %1 = vector.load %arg1[%c0_1, %c128] : memref<8x136xf32, #tpu.memory_space<vmem>>, vector<8x8xf32>
    %2 = arith.truncf %1 : vector<8x8xf32> to vector<8x8xbf16>
    %c0_2 = arith.constant 0 : index
    %c0_3 = arith.constant 0 : index
    %3 = vector.load %arg2[%c0_2, %c0_3] : memref<8x128xbf16, #tpu.memory_space<vmem>>, vector<8x128xbf16>
    %cst = arith.constant dense<0.000000e+00> : vector<8x128xf32>
    %4 = tpu.matmul %2, %3, %cst {dimension_numbers = #tpu.dot_dimension_numbers<[1], [0], [0], [1], [0, 0, 1, 1], [], []>} : vector<8x8xbf16>, vector<8x128xbf16>, vector<8x128xf32> -> vector<8x128xf32>
    %c0_4 = arith.constant 0 : index
    %c0_5 = arith.constant 0 : index
    %5 = vector.load %arg3[%c0_4, %c0_5] : memref<1x128xf32, #tpu.memory_space<vmem>>, vector<1x128xf32>
    %6 = vector.broadcast %5 : vector<1x128xf32> to vector<8x128xf32>
    %7 = arith.addf %4, %6 : vector<8x128xf32>
    %8 = arith.truncf %7 : vector<8x128xf32> to vector<8x128xbf16>
    %9 = math.tanh %8 : vector<8x128xbf16>
    %c0_6 = arith.constant 0 : index
    %c0_7 = arith.constant 0 : index
    %10 = vector.load %arg4[%c0_6, %c0_7] : memref<128x128xbf16, #tpu.memory_space<vmem>>, vector<128x128xbf16>
    %cst_8 = arith.constant dense<0.000000e+00> : vector<8x128xf32>
    %11 = tpu.matmul %9, %10, %cst_8 {dimension_numbers = #tpu.dot_dimension_numbers<[1], [0], [0], [1], [0, 0, 1, 1], [], []>} : vector<8x128xbf16>, vector<128x128xbf16>, vector<8x128xf32> -> vector<8x128xf32>
    %c0_9 = arith.constant 0 : index
    %c0_10 = arith.constant 0 : index
    %12 = vector.load %arg5[%c0_9, %c0_10] : memref<1x128xf32, #tpu.memory_space<vmem>>, vector<1x128xf32>
    %13 = vector.broadcast %12 : vector<1x128xf32> to vector<8x128xf32>
    %14 = arith.addf %11, %13 : vector<8x128xf32>
    %15 = arith.truncf %14 : vector<8x128xf32> to vector<8x128xbf16>
    %16 = math.tanh %15 : vector<8x128xbf16>
    %c0_11 = arith.constant 0 : index
    %c0_12 = arith.constant 0 : index
    %17 = vector.load %arg6[%c0_11, %c0_12] : memref<128x128xbf16, #tpu.memory_space<vmem>>, vector<128x128xbf16>
    %cst_13 = arith.constant dense<0.000000e+00> : vector<8x128xf32>
    %18 = tpu.matmul %16, %17, %cst_13 {dimension_numbers = #tpu.dot_dimension_numbers<[1], [0], [0], [1], [0, 0, 1, 1], [], []>} : vector<8x128xbf16>, vector<128x128xbf16>, vector<8x128xf32> -> vector<8x128xf32>
    %c0_14 = arith.constant 0 : index
    %c0_15 = arith.constant 0 : index
    %19 = vector.load %arg7[%c0_14, %c0_15] : memref<1x128xf32, #tpu.memory_space<vmem>>, vector<1x128xf32>
    %20 = vector.broadcast %19 : vector<1x128xf32> to vector<8x128xf32>
    %21 = arith.addf %18, %20 : vector<8x128xf32>
    %22 = arith.truncf %0 : vector<8x128xf32> to vector<8x128xbf16>
    %c0_16 = arith.constant 0 : index
    %c0_17 = arith.constant 0 : index
    %23 = vector.load %arg8[%c0_16, %c0_17] : memref<128x256xbf16, #tpu.memory_space<vmem>>, vector<128x256xbf16>
    %cst_18 = arith.constant dense<0.000000e+00> : vector<8x256xf32>
    %24 = tpu.matmul %22, %23, %cst_18 {dimension_numbers = #tpu.dot_dimension_numbers<[1], [0], [0], [1], [0, 0, 1, 1], [], []>} : vector<8x128xbf16>, vector<128x256xbf16>, vector<8x256xf32> -> vector<8x256xf32>
    %25 = arith.truncf %1 : vector<8x8xf32> to vector<8x8xbf16>
    %c0_19 = arith.constant 0 : index
    %c0_20 = arith.constant 0 : index
    %26 = vector.load %arg9[%c0_19, %c0_20] : memref<8x256xbf16, #tpu.memory_space<vmem>>, vector<8x256xbf16>
    %cst_21 = arith.constant dense<0.000000e+00> : vector<8x256xf32>
    %27 = tpu.matmul %25, %26, %cst_21 {dimension_numbers = #tpu.dot_dimension_numbers<[1], [0], [0], [1], [0, 0, 1, 1], [], []>} : vector<8x8xbf16>, vector<8x256xbf16>, vector<8x256xf32> -> vector<8x256xf32>
    %28 = arith.addf %24, %27 : vector<8x256xf32>
    %c0_22 = arith.constant 0 : index
    %c0_23 = arith.constant 0 : index
    %29 = vector.load %arg10[%c0_22, %c0_23] : memref<1x256xf32, #tpu.memory_space<vmem>>, vector<1x256xf32>
    %30 = vector.broadcast %29 : vector<1x256xf32> to vector<8x256xf32>
    %31 = arith.addf %28, %30 : vector<8x256xf32>
    %32 = vector.extract_strided_slice %31 {offsets = [0, 0], sizes = [8, 128], strides = [1, 1]} : vector<8x256xf32> to vector<8x128xf32>
    %cst_24 = arith.constant 0.00999999977 : f32
    %33 = vector.broadcast %cst_24 : f32 to vector<8x128xf32>
    %34 = arith.mulf %33, %32 : vector<8x128xf32>
    %35 = arith.maximumf %32, %34 : vector<8x128xf32>
    %36 = arith.truncf %35 : vector<8x128xf32> to vector<8x128xbf16>
    %c0_25 = arith.constant 0 : index
    %c0_26 = arith.constant 0 : index
    %37 = vector.load %arg11[%c0_25, %c0_26] : memref<128x128xbf16, #tpu.memory_space<vmem>>, vector<128x128xbf16>
    %cst_27 = arith.constant dense<0.000000e+00> : vector<8x128xf32>
    %38 = tpu.matmul %36, %37, %cst_27 {dimension_numbers = #tpu.dot_dimension_numbers<[1], [0], [0], [1], [0, 0, 1, 1], [], []>} : vector<8x128xbf16>, vector<128x128xbf16>, vector<8x128xf32> -> vector<8x128xf32>
    %c0_28 = arith.constant 0 : index
    %c0_29 = arith.constant 0 : index
    %39 = vector.load %arg12[%c0_28, %c0_29] : memref<1x128xf32, #tpu.memory_space<vmem>>, vector<1x128xf32>
    %40 = vector.broadcast %39 : vector<1x128xf32> to vector<8x128xf32>
    %41 = arith.addf %38, %40 : vector<8x128xf32>
    %cst_30 = arith.constant 0.00999999977 : f32
    %42 = vector.broadcast %cst_30 : f32 to vector<8x128xf32>
    %43 = arith.mulf %42, %41 : vector<8x128xf32>
    %44 = arith.maximumf %41, %43 : vector<8x128xf32>
    %45 = arith.addf %44, %21 : vector<8x128xf32>
    %46 = arith.truncf %45 : vector<8x128xf32> to vector<8x128xbf16>
    %c0_31 = arith.constant 0 : index
    %c0_32 = arith.constant 0 : index
    %47 = vector.load %arg13[%c0_31, %c0_32] : memref<128x128xbf16, #tpu.memory_space<vmem>>, vector<128x128xbf16>
    %cst_33 = arith.constant dense<0.000000e+00> : vector<8x128xf32>
    %48 = tpu.matmul %46, %47, %cst_33 {dimension_numbers = #tpu.dot_dimension_numbers<[1], [0], [0], [1], [0, 0, 1, 1], [], []>} : vector<8x128xbf16>, vector<128x128xbf16>, vector<8x128xf32> -> vector<8x128xf32>
    %c0_34 = arith.constant 0 : index
    %c0_35 = arith.constant 0 : index
    %49 = vector.load %arg14[%c0_34, %c0_35] : memref<1x128xf32, #tpu.memory_space<vmem>>, vector<1x128xf32>
    %50 = vector.broadcast %49 : vector<1x128xf32> to vector<8x128xf32>
    %51 = arith.addf %48, %50 : vector<8x128xf32>
    %52 = arith.truncf %51 : vector<8x128xf32> to vector<8x128xbf16>
    %53 = math.tanh %52 : vector<8x128xbf16>
    %c0_36 = arith.constant 0 : index
    %c0_37 = arith.constant 0 : index
    %54 = vector.load %arg15[%c0_36, %c0_37] : memref<128x128xbf16, #tpu.memory_space<vmem>>, vector<128x128xbf16>
    %cst_38 = arith.constant dense<0.000000e+00> : vector<8x128xf32>
    %55 = tpu.matmul %53, %54, %cst_38 {dimension_numbers = #tpu.dot_dimension_numbers<[1], [0], [0], [1], [0, 0, 1, 1], [], []>} : vector<8x128xbf16>, vector<128x128xbf16>, vector<8x128xf32> -> vector<8x128xf32>
    %c0_39 = arith.constant 0 : index
    %c0_40 = arith.constant 0 : index
    %56 = vector.load %arg16[%c0_39, %c0_40] : memref<1x128xf32, #tpu.memory_space<vmem>>, vector<1x128xf32>
    %57 = vector.broadcast %56 : vector<1x128xf32> to vector<8x128xf32>
    %58 = arith.addf %55, %57 : vector<8x128xf32>
    %59 = arith.truncf %58 : vector<8x128xf32> to vector<8x128xbf16>
    %60 = math.tanh %59 : vector<8x128xbf16>
    %61 = vector.extract_strided_slice %31 {offsets = [0, 128], sizes = [8, 128], strides = [1, 1]} : vector<8x256xf32> to vector<8x128xf32>
    %62 = arith.truncf %61 : vector<8x128xf32> to vector<8x128xbf16>
    %63 = math.tanh %62 : vector<8x128xbf16>
    %64 = arith.extf %63 : vector<8x128xbf16> to vector<8x128xf32>
    %c0_41 = arith.constant 0 : index
    %c0_42 = arith.constant 0 : index
    %65 = vector.load %arg19[%c0_41, %c0_42] : memref<1x128xf32, #tpu.memory_space<vmem>>, vector<1x128xf32>
    %66 = vector.broadcast %65 : vector<1x128xf32> to vector<8x128xf32>
    %67 = arith.mulf %64, %66 : vector<8x128xf32>
    %cst_43 = arith.constant dense<0.000000e+00> : vector<8xf32>
    %68 = vector.multi_reduction <add>, %67, %cst_43 [1] : vector<8x128xf32> to vector<8xf32>
    %69 = vector.shape_cast %68 : vector<8xf32> to vector<8x1xf32>
    %c0_44 = arith.constant 0 : index
    %c0_45 = arith.constant 0 : index
    %70 = vector.load %arg17[%c0_44, %c0_45] : memref<128x8xbf16, #tpu.memory_space<vmem>>, vector<128x8xbf16>
    %cst_46 = arith.constant dense<0.000000e+00> : vector<8x8xf32>
    %71 = tpu.matmul %60, %70, %cst_46 {dimension_numbers = #tpu.dot_dimension_numbers<[1], [0], [0], [1], [0, 0, 1, 1], [], []>} : vector<8x128xbf16>, vector<128x8xbf16>, vector<8x8xf32> -> vector<8x8xf32>
    %c0_47 = arith.constant 0 : index
    %c0_48 = arith.constant 0 : index
    %72 = vector.load %arg18[%c0_47, %c0_48] : memref<1x8xf32, #tpu.memory_space<vmem>>, vector<1x8xf32>
    %73 = vector.broadcast %72 : vector<1x8xf32> to vector<8x8xf32>
    %74 = arith.addf %71, %73 : vector<8x8xf32>
    %75 = tpu.iota {dimensions = array<i32: 1>} : vector<8x8xi32>
    %c4_i32 = arith.constant 4 : i32
    %76 = vector.broadcast %c4_i32 : i32 to vector<8x8xi32>
    %77 = arith.cmpi eq, %75, %76 : vector<8x8xi32>
    %cst_49 = arith.constant 0.000000e+00 : f32
    %78 = vector.shape_cast %69 : vector<8x1xf32> to vector<8x1xf32>
    %79 = vector.broadcast %78 : vector<8x1xf32> to vector<8x8xf32>
    %80 = vector.broadcast %cst_49 : f32 to vector<8x8xf32>
    %81 = arith.select %77, %79, %80 : vector<8x8xi1>, vector<8x8xf32>
    %82 = arith.addf %74, %81 : vector<8x8xf32>
    %c0_50 = arith.constant 0 : index
    %c0_51 = arith.constant 0 : index
    %83 = vector.load %arg20[%c0_50, %c0_51] : memref<8x8xf32, #tpu.memory_space<vmem>>, vector<8x8xf32>
    tpu.vector_store %arg20[%c0_50, %c0_51], %82 {strides = array<i32>} : memref<8x8xf32, #tpu.memory_space<vmem>>, vector<8x8xf32>,
    return
  }
  func.func @transform_0(%arg0: i32) -> (i32, i32) {
    %c0_i32 = arith.constant 0 : i32
    %c0_i32_0 = arith.constant 0 : i32
    return %arg0, %c0_i32 : i32, i32
  }
  func.func @transform_1(%arg0: i32) -> (i32, i32) {
    %c0_i32 = arith.constant 0 : i32
    %c0_i32_0 = arith.constant 0 : i32
    %c0_i32_1 = arith.constant 0 : i32
    return %c0_i32, %c0_i32_0 : i32, i32
  }
  func.func @transform_2(%arg0: i32) -> (i32, i32) {
    %c0_i32 = arith.constant 0 : i32
    %c0_i32_0 = arith.constant 0 : i32
    %c0_i32_1 = arith.constant 0 : i32
    return %c0_i32, %c0_i32_0 : i32, i32
  }
  func.func @transform_3(%arg0: i32) -> (i32, i32) {
    %c0_i32 = arith.constant 0 : i32
    %c0_i32_0 = arith.constant 0 : i32
    %c0_i32_1 = arith.constant 0 : i32
    return %c0_i32, %c0_i32_0 : i32, i32
  }
  func.func @transform_4(%arg0: i32) -> (i32, i32) {
    %c0_i32 = arith.constant 0 : i32
    %c0_i32_0 = arith.constant 0 : i32
    %c0_i32_1 = arith.constant 0 : i32
    return %c0_i32, %c0_i32_0 : i32, i32
  }
  func.func @transform_5(%arg0: i32) -> (i32, i32) {
    %c0_i32 = arith.constant 0 : i32
    %c0_i32_0 = arith.constant 0 : i32
    %c0_i32_1 = arith.constant 0 : i32
    return %c0_i32, %c0_i32_0 : i32, i32
  }
  func.func @transform_6(%arg0: i32) -> (i32, i32) {
    %c0_i32 = arith.constant 0 : i32
    %c0_i32_0 = arith.constant 0 : i32
    %c0_i32_1 = arith.constant 0 : i32
    return %c0_i32, %c0_i32_0 : i32, i32
  }
  func.func @transform_7(%arg0: i32) -> (i32, i32) {
    %c0_i32 = arith.constant 0 : i32
    %c0_i32_0 = arith.constant 0 : i32
    %c0_i32_1 = arith.constant 0 : i32
    return %c0_i32, %c0_i32_0 : i32, i32
  }
  func.func @transform_8(%arg0: i32) -> (i32, i32) {
    %c0_i32 = arith.constant 0 : i32
    %c0_i32_0 = arith.constant 0 : i32
    %c0_i32_1 = arith.constant 0 : i32
    return %c0_i32, %c0_i32_0 : i32, i32
  }
  func.func @transform_9(%arg0: i32) -> (i32, i32) {
    %c0_i32 = arith.constant 0 : i32
    %c0_i32_0 = arith.constant 0 : i32
    %c0_i32_1 = arith.constant 0 : i32
    return %c0_i32, %c0_i32_0 : i32, i32
  }
  func.func @transform_10(%arg0: i32) -> (i32, i32) {
    %c0_i32 = arith.constant 0 : i32
    %c0_i32_0 = arith.constant 0 : i32
    %c0_i32_1 = arith.constant 0 : i32
    return %c0_i32, %c0_i32_0 : i32, i32
  }
  func.func @transform_11(%arg0: i32) -> (i32, i32) {
    %c0_i32 = arith.constant 0 : i32
    %c0_i32_0 = arith.constant 0 : i32
    %c0_i32_1 = arith.constant 0 : i32
    return %c0_i32, %c0_i32_0 : i32, i32
  }
  func.func @transform_12(%arg0: i32) -> (i32, i32) {
    %c0_i32 = arith.constant 0 : i32
    %c0_i32_0 = arith.constant 0 : i32
    %c0_i32_1 = arith.constant 0 : i32
    return %c0_i32, %c0_i32_0 : i32, i32
  }
  func.func @transform_13(%arg0: i32) -> (i32, i32) {
    %c0_i32 = arith.constant 0 : i32
    %c0_i32_0 = arith.constant 0 : i32
    %c0_i32_1 = arith.constant 0 : i32
    return %c0_i32, %c0_i32_0 : i32, i32
  }
  func.func @transform_14(%arg0: i32) -> (i32, i32) {
    %c0_i32 = arith.constant 0 : i32
    %c0_i32_0 = arith.constant 0 : i32
    %c0_i32_1 = arith.constant 0 : i32
    return %c0_i32, %c0_i32_0 : i32, i32
  }
  func.func @transform_15(%arg0: i32) -> (i32, i32) {
    %c0_i32 = arith.constant 0 : i32
    %c0_i32_0 = arith.constant 0 : i32
    %c0_i32_1 = arith.constant 0 : i32
    return %c0_i32, %c0_i32_0 : i32, i32
  }
  func.func @transform_16(%arg0: i32) -> (i32, i32) {
    %c0_i32 = arith.constant 0 : i32
    %c0_i32_0 = arith.constant 0 : i32
    %c0_i32_1 = arith.constant 0 : i32
    return %c0_i32, %c0_i32_0 : i32, i32
  }
  func.func @transform_17(%arg0: i32) -> (i32, i32) {
    %c0_i32 = arith.constant 0 : i32
    %c0_i32_0 = arith.constant 0 : i32
    %c0_i32_1 = arith.constant 0 : i32
    return %c0_i32, %c0_i32_0 : i32, i32
  }
  func.func @transform_18(%arg0: i32) -> (i32, i32) {
    %c0_i32 = arith.constant 0 : i32
    %c0_i32_0 = arith.constant 0 : i32
    %c0_i32_1 = arith.constant 0 : i32
    return %c0_i32, %c0_i32_0 : i32, i32
  }
  func.func @transform_19(%arg0: i32) -> (i32, i32) {
    %c0_i32 = arith.constant 0 : i32
    %c0_i32_0 = arith.constant 0 : i32
    return %arg0, %c0_i32 : i32, i32
  }
}

</mosaic_0001>

<bundles_post_ra>
// kernel: _policy_forward.1
= control target key start
LH: loop header
LB: loop body
LE: loop exit
PB: predicated region body
PF: predicated region fallthrough
CT: control target
= control target key end

     0   :  { %s2028_s0 = inlined_call_operand.hbm [shape: f32[8,136], index: 0, kind: input, shape index: {}]   ;;  %s2029_s1 = inlined_call_operand.vmem [shape: bf16[8,128], index: 1, kind: input, shape index: {}]   ;;  %s2030_s2 = inlined_call_operand.vmem [shape: f32[1,128], index: 2, kind: input, shape index: {}]   ;;  %s2031_s3 = inlined_call_operand.vmem [shape: bf16[128,128], index: 3, kind: input, shape index: {}]   ;;  %s2032_s4 = inlined_call_operand.hbm [shape: f32[1,128], index: 4, kind: input, shape index: {}]   ;;  %s2033_s5 = inlined_call_operand.hbm [shape: bf16[128,128], index: 5, kind: input, shape index: {}]   ;;  %s2034_s6 = inlined_call_operand.vmem [shape: f32[1,128], index: 6, kind: input, shape index: {}]   ;;  %s2035_s7 = inlined_call_operand.hbm [shape: bf16[128,256], index: 7, kind: input, shape index: {}]   ;;  %s2036_s8 = inlined_call_operand.vmem [shape: bf16[8,256], index: 8, kind: input, shape index: {}]   ;;  %s2037_s9 = inlined_call_operand.vmem [shape: f32[1,256], index: 9, kind: input, shape index: {}]   ;;  %s2038_s10 = inlined_call_operand.hbm [shape: bf16[128,128], index: 10, kind: input, shape index: {}]   ;;  %s2039_s11 = inlined_call_operand.vmem [shape: f32[1,128], index: 11, kind: input, shape index: {}]   ;;  %s2040_s12 = inlined_call_operand.hbm [shape: bf16[128,128], index: 12, kind: input, shape index: {}]   ;;  %s2041_s13 = inlined_call_operand.vmem [shape: f32[1,128], index: 13, kind: input, shape index: {}]   ;;  %s2042_s14 = inlined_call_operand.hbm [shape: bf16[128,128], index: 14, kind: input, shape index: {}]   ;;  %s2043_s15 = inlined_call_operand.vmem [shape: f32[1,128], index: 15, kind: input, shape index: {}]   ;;  %s2044_s16 = inlined_call_operand.vmem [shape: bf16[128,8], index: 16, kind: input, shape index: {}]   ;;  %s2045_s17 = inlined_call_operand.vmem [shape: f32[1,8], index: 17, kind: input, shape index: {}]   ;;  %s2046_s18 = inlined_call_operand.vmem [shape: f32[1,128], index: 18, kind: input, shape index: {}]   ;;  %s2047_s19 = inlined_call_operand.vmem [shape: f32[8,8], index: 19, kind: output, shape index: {}]  }
   0x1   :  { %2050 = sst [smem:[#allocation17_spill]] %s2028_s0 }
   0x2   :  { %2051 = sst [smem:[#allocation18_spill]] %s2029_s1 }
   0x3   :  { %2052 = sst [smem:[#allocation19_spill]] %s2030_s2 }
   0x4   :  { %2053 = sst [smem:[#allocation20_spill]] %s2031_s3 }
   0x5   :  { %24 = vsyncpa [#allocation3], 0 }
   0x6   :  { %25 = vsyncpa [#allocation5], 0 }
   0x7   :  { %26 = vsyncpa [#allocation8], 0 }
   0x8   :  { %27 = vsyncpa [#allocation11], 0  ;;  %s1645_s0 = smov [#allocation4]   ;;  %s1646_s20 = smov [#allocation7]  }
   0x9   :  { %s50_s30 = sshll.u32 %s1645_s0, 4  ;;  %s73_s21 = sshll.u32 %s1646_s20, 4  ;;  %s51_s30 = int_to_ptr.vmem [resolvable:$true] %s50_s30  ;;  %s1759_s21 = int_to_ptr.vmem [resolvable:$true] %s73_s21 }
   0xa   :  { %s1483_s2 = scalar_lea.hbm %s2032_s4, 16 }
   0xb   :  { %p1484_p0 = scmp.ne.s32.totalorder %s2032_s4, %s1483_s2  ;;  %p1487_p1 = scmp.lt.u32.totalorder %s1483_s2, %s2032_s4 }
   0xd   :  { %p1489_p2 = pnand %p1487_p1, %p1484_p0 }
   0xf   :  { %1492 = shalt.err (!%p1489_p2)
}
  0x10   :  { %s1493_s26 = scalar_lea.vmem %s51_s30, 16  ;;  %s1497_s27 = scalar_lea.vmem %s51_s30, 32 }
  0x11   :  { %p1494_p3 = scmp.ne.s32.totalorder %s51_s30, %s1493_s26  ;;  %p1498_p4 = scmp.lt.s32.totalorder %s51_s30, %s51_s30 }
  0x12   :  { %p1499_p5 = scmp.lt.s32.totalorder %s1497_s27, %s1493_s26 }
  0x14   :  { %p1500_p6 = por %p1499_p5, %p1498_p4 }
  0x16   :  { %p1501_p7 = pnand %p1500_p6, %p1494_p3 }
  0x18   :  { %1504 = shalt.err (!%p1501_p7)
}
  0x19   :  { %53 = dma.hbm_to_vmem [thread:$0]  %s2032_s4, 16, %s51_s30, [#allocation5]  }
  0x1a   :  { %s1505_s1 = scalar_lea.hbm %s2035_s7, 2048 }
  0x1b   :  { %p1506_p8 = scmp.ne.s32.totalorder %s2035_s7, %s1505_s1  ;;  %p1509_p9 = scmp.lt.u32.totalorder %s1505_s1, %s2035_s7 }
  0x1d   :  { %p1511_p10 = pnand %p1509_p9, %p1506_p8 }
  0x1f   :  { %1514 = shalt.err (!%p1511_p10)
}
  0x20   :  { %s1515_s25 = scalar_lea.vmem %s1759_s21, 2048  ;;  %p1520_p12 = scmp.lt.s32.totalorder %s1759_s21, %s1759_s21 }
  0x21   :  { %p1516_p11 = scmp.ne.s32.totalorder %s1759_s21, %s1515_s25  ;;  %p1521_p13 = scmp.lt.s32.totalorder %s1515_s25, %s1515_s25 }
  0x23   :  { %p1522_p0 = por %p1521_p13, %p1520_p12 }
  0x25   :  { %p1523_p1 = pnand %p1522_p0, %p1516_p11 }
  0x27   :  { %1526 = shalt.err (!%p1523_p1)
}
  0x28   :  { %s1647_s4 = smov 128   ;;  %s1648_s30 = smov 8  }
  0x29   :  { %79 = dma.hbm_to_vmem [thread:$0]  %s2035_s7, 2048, %s1759_s21, [#allocation8], %s1647_s4, %s1647_s4, %s1648_s30  }
  0x2a   :  { %s1649_s27 = smov [#allocation10]   ;;  %s1650_s29 = smov [#allocation2]  }
  0x2b   :  { %s103_s28 = sshll.u32 %s1649_s27, 4  ;;  %s34_s0 = sshll.u32 %s1650_s29, 4  ;;  %s104_s28 = int_to_ptr.vmem [resolvable:$true] %s103_s28  ;;  %s35_s0 = int_to_ptr.vmem [resolvable:$true] %s34_s0 }
  0x2c   :  { %s1527_s22 = scalar_lea.hbm %s2040_s12, 1024 }
  0x2d   :  { %p1528_p2 = scmp.ne.s32.totalorder %s2040_s12, %s1527_s22  ;;  %p1531_p3 = scmp.lt.u32.totalorder %s1527_s22, %s2040_s12 }
  0x2f   :  { %p1533_p4 = pnand %p1531_p3, %p1528_p2 }
  0x31   :  { %1536 = shalt.err (!%p1533_p4)
}
  0x32   :  { %s1537_s7 = scalar_lea.vmem %s104_s28, 1024  ;;  %p1542_p6 = scmp.lt.s32.totalorder %s104_s28, %s104_s28 }
  0x33   :  { %p1538_p5 = scmp.ne.s32.totalorder %s104_s28, %s1537_s7  ;;  %p1543_p7 = scmp.lt.s32.totalorder %s1537_s7, %s1537_s7 }
  0x35   :  { %p1544_p8 = por %p1543_p7, %p1542_p6 }
  0x37   :  { %p1545_p9 = pnand %p1544_p8, %p1538_p5 }
  0x39   :  { %1548 = shalt.err (!%p1545_p9)
}
  0x3a   :  { %s1651_s21 = smov 64   ;;  %s1652_s4 = smov 4  }
  0x3b   :  { %109 = dma.hbm_to_vmem [thread:$0]  %s2040_s12, 1024, %s104_s28, [#allocation11], %s1651_s21, %s1651_s21, %s1652_s4  }
  0x3c   :  { %s2054_s29 = sld [smem:[#allocation17_spill]] }
  0x42   :  { %s1549_s20 = scalar_lea.hbm %s2054_s29, 256 }
  0x43   :  { %p1550_p10 = scmp.ne.s32.totalorder %s2054_s29, %s1549_s20  ;;  %p1553_p11 = scmp.lt.u32.totalorder %s1549_s20, %s2054_s29 }
  0x45   :  { %p1555_p12 = pnand %p1553_p11, %p1550_p10 }
  0x47   :  { %1558 = shalt.err (!%p1555_p12)
}
  0x48   :  { %s1559_s24 = scalar_lea.vmem %s35_s0, 256  ;;  %p1564_p0 = scmp.lt.s32.totalorder %s35_s0, %s35_s0 }
  0x49   :  { %p1560_p13 = scmp.ne.s32.totalorder %s35_s0, %s1559_s24  ;;  %p1565_p1 = scmp.lt.s32.totalorder %s1559_s24, %s1559_s24 }
  0x4b   :  { %p1566_p2 = por %p1565_p1, %p1564_p0 }
  0x4d   :  { %p1567_p3 = pnand %p1566_p2, %p1560_p13 }
  0x4f   :  { %1570 = shalt.err (!%p1567_p3)
}
  0x50   :  { %37 = dma.hbm_to_vmem [thread:$0]  %s2054_s29, 256, %s35_s0, [#allocation3]  }
  0x51   :  { %s1653_s25 = smov [#allocation6]   ;;  %s1654_s30 = smov [#allocation9]  }
  0x52   :  { %s59_s7 = sshll.u32 %s1653_s25, 4  ;;  %s89_s3 = sshll.u32 %s1654_s30, 4  ;;  %s60_s7 = int_to_ptr.vmem [resolvable:$true] %s59_s7  ;;  %s1817_s3 = int_to_ptr.vmem [resolvable:$true] %s89_s3 }
  0x53   :  { %s1571_s20 = scalar_lea.hbm %s2033_s5, 1024 }
  0x54   :  { %p1572_p4 = scmp.ne.s32.totalorder %s2033_s5, %s1571_s20  ;;  %p1575_p5 = scmp.lt.u32.totalorder %s1571_s20, %s2033_s5 }
  0x56   :  { %p1577_p6 = pnand %p1575_p5, %p1572_p4 }
  0x58   :  { %1580 = shalt.err (!%p1577_p6)
}
  0x59   :  { %s1581_s0 = scalar_lea.vmem %s60_s7, 1024  ;;  %p1586_p8 = scmp.lt.s32.totalorder %s60_s7, %s60_s7 }
  0x5a   :  { %p1582_p7 = scmp.ne.s32.totalorder %s60_s7, %s1581_s0  ;;  %p1587_p9 = scmp.lt.s32.totalorder %s1581_s0, %s1581_s0 }
  0x5c   :  { %p1588_p10 = por %p1587_p9, %p1586_p8 }
  0x5e   :  { %p1589_p11 = pnand %p1588_p10, %p1582_p7 }
  0x60   :  { %1592 = shalt.err (!%p1589_p11)
}
  0x61   :  { %65 = dma.hbm_to_vmem [thread:$0]  %s2033_s5, 1024, %s60_s7, [#allocation5], %s1651_s21, %s1651_s21, %s1652_s4  }
  0x62   :  { %s1593_s25 = scalar_lea.hbm %s2038_s10, 1024 }
  0x63   :  { %p1594_p12 = scmp.ne.s32.totalorder %s2038_s10, %s1593_s25  ;;  %p1597_p13 = scmp.lt.u32.totalorder %s1593_s25, %s2038_s10 }
  0x65   :  { %p1599_p0 = pnand %p1597_p13, %p1594_p12 }
  0x67   :  { %1602 = shalt.err (!%p1599_p0)
}
  0x68   :  { %s1603_s1 = scalar_lea.vmem %s1817_s3, 1024  ;;  %p1608_p2 = scmp.lt.s32.totalorder %s1817_s3, %s1817_s3 }
  0x69   :  { %p1604_p1 = scmp.ne.s32.totalorder %s1817_s3, %s1603_s1  ;;  %p1609_p3 = scmp.lt.s32.totalorder %s1603_s1, %s1603_s1 }
  0x6b   :  { %p1610_p4 = por %p1609_p3, %p1608_p2 }
  0x6d   :  { %p1611_p5 = pnand %p1610_p4, %p1604_p1 }
  0x6f   :  { %1614 = shalt.err (!%p1611_p5)
}
  0x70   :  { %95 = dma.hbm_to_vmem [thread:$0]  %s2038_s10, 1024, %s1817_s3, [#allocation8], %s1651_s21, %s1651_s21, %s1652_s4  }
  0x71   :  { %s1655_s22 = smov [#allocation12]   ;;  %s1615_s29 = scalar_lea.hbm %s2042_s14, 1024 }
  0x72   :  { %s117_s2 = sshll.u32 %s1655_s22, 4  ;;  %p1616_p6 = scmp.ne.s32.totalorder %s2042_s14, %s1615_s29  ;;  %s118_s2 = int_to_ptr.vmem [resolvable:$true] %s117_s2 }
  0x73   :  { %p1619_p7 = scmp.lt.u32.totalorder %s1615_s29, %s2042_s14 }
  0x75   :  { %p1621_p8 = pnand %p1619_p7, %p1616_p6 }
  0x77   :  { %1624 = shalt.err (!%p1621_p8)
}
  0x78   :  { %s1625_s30 = scalar_lea.vmem %s118_s2, 1024  ;;  %p1630_p10 = scmp.lt.s32.totalorder %s118_s2, %s118_s2 }
  0x79   :  { %p1626_p9 = scmp.ne.s32.totalorder %s118_s2, %s1625_s30  ;;  %p1631_p11 = scmp.lt.s32.totalorder %s1625_s30, %s1625_s30 }
  0x7b   :  { %p1632_p12 = por %p1631_p11, %p1630_p10 }
  0x7d   :  { %p1633_p13 = pnand %p1632_p12, %p1626_p9 }
  0x7f   :  { %1636 = shalt.err (!%p1633_p13)
}
  0x80   :  { %123 = dma.hbm_to_vmem [thread:$0]  %s2042_s14, 1024, %s118_s2, [#allocation11], %s1651_s21, %s1651_s21, %s1652_s4  }
  0x81   :  { %1637 = dma.done.wait [#allocation3], 256  }
  0x82   :  { %1638 = vsyncadd [#allocation3], 4294967040 }
  0x83   :  { %1639 = dma.done.wait [#allocation5], 1040  }
  0x84   :  { %1640 = vsyncadd [#allocation5], 4294966256 }
  0x85   :  { %1641 = dma.done.wait [#allocation8], 3072  }
  0x86   :  { %1642 = vsyncadd [#allocation8], 4294964224 }
  0x87   :  { %1643 = dma.done.wait [#allocation11], 2048  }
  0x88   :  { %1644 = vsyncadd [#allocation11], 4294965248  ;;  %v1656_v0 = vmov 0.0   ;;  %vm1657_vm0 = vmmov 0   ;;  %vm169_vm1 = vcmask 1043456   ;;  %s2055_s4 = sld [smem:[#allocation18_spill]] }
  0x89   :  { %1259 = vmatprep.subr.bf16.mxu1 %v1656_v0  ;;  %1261 = vmatprep.mubr.msk.bf16.mxu1 %vm1657_vm0, %v1656_v0  ;;  %v155_v2 = vld [vmem:[#allocation2 + $0x8] sm:$0xff]  ;;  %vm165_vm2 = vcmask 64512   ;;  %s2056_s20 = sld [smem:[#allocation20_spill]]  ;;  %v1407_v13 = vld [vmem:[#allocation6] sm:$0xff]   ;;  %v1408_v14 = vld [vmem:[#allocation6 + $0x8] sm:$0xff]   ;;  %s2057_s21 = sld [smem:[#allocation19_spill]] }
  0x8a   :  { %1285 = vmatprep.subr.bf16.mxu0 %v1656_v0  ;;  %1301 = vmatprep.mubr.msk.bf16.mxu0 %vm1657_vm0, %v1656_v0  ;;  %v1879_v4 = vpack.c.bf16 %v155_v2, %v155_v2  ;;  %v1409_v15 = vld [vmem:[#allocation6 + $0x10] sm:$0xff]   ;;  %v1410_v16 = vld [vmem:[#allocation6 + $0x18] sm:$0xff]   ;;  %v1411_v25 = vld [vmem:[#allocation6 + $0x20] sm:$0xff]   ;;  %v1658_v34 = vmov 0  }
  0x8b   :  { %1286 = vmatpush3.bf16.msra.mxu0 %v1407_v13  ;;  %v1412_v26 = vld [vmem:[#allocation6 + $0x28] sm:$0xff]   ;;  %v1413_v27 = vld [vmem:[#allocation6 + $0x30] sm:$0xff]   ;;  %v1414_v28 = vld [vmem:[#allocation6 + $0x38] sm:$0xff]   ;;  %v632_v13 = vlaneseq }
  0x8c   :  { %1287 = vmatprep.subr.bf16.mxu0 %v1656_v0  ;;  %v1417_v29 = vld [vmem:[#allocation7 + $0x4] ss:$8 sps:$4 sm:$0xff]   ;;  %v1128_v35 = vld [vmem:[#allocation4] ss:$0 sm:$0xff]  ;;  %v1415_v42 = vld [vmem:[#allocation7] ss:$8 sps:$4 sm:$0xff]  }
  0x8d   :  { %v456_v30 = vld [vmem:[%s2036_s8] sm:$0xff]  ;;  %v1421_v47 = vld [vmem:[#allocation7 + $0x20] ss:$8 sps:$4 sm:$0xff]   ;;  %v1444_v63 = vld [vmem:[#allocation9 + $0x18] sm:$0xff]  }
  0x8e   :  { %v157_v1 = vld [vmem:[%s2055_s4] sm:$0xf]  ;;  %v1147_v31 = vcombine.high %v456_v30, %v456_v30  ;;  %v1146_v32 = vcombine.low %v456_v30, %v456_v30  ;;  %v1420_v43 = vld [vmem:[#allocation7 + $0x14] ss:$8 sps:$4 sm:$0xff]   ;;  %v1427_v51 = vld [vmem:[#allocation7 + $0x40] ss:$8 sps:$4 sm:$0xff]  }
  0x8f   :  { %v171_v3 = vsel %vm169_vm1, %v157_v1, 0  ;;  %v1399_v5 = vld [vmem:[%s2056_s20] sm:$0xff]   ;;  %v1400_v6 = vld [vmem:[%s2056_s20 + $0x8] sm:$0xff]   ;;  %v1401_v7 = vld [vmem:[%s2056_s20 + $0x10] sm:$0xff]   ;;  %1288 = vmatpush3.bf16.msra.mxu0 %v1408_v14  ;;  %v633_v14 = vshrl.u32 %v632_v13, 7 }
  0x90   :  { %1260 = vmatpush3.bf16.msra.mxu1 %v171_v3  ;;  %v1402_v8 = vld [vmem:[%s2056_s20 + $0x18] sm:$0xff]   ;;  %v1403_v9 = vld [vmem:[%s2056_s20 + $0x20] sm:$0xff]   ;;  %v1404_v10 = vld [vmem:[%s2056_s20 + $0x28] sm:$0xff]   ;;  %1289 = vmatprep.subr.bf16.mxu0 %v1656_v0  ;;  %v463_v33 = vsel %vm169_vm1, %v1146_v32, 0 }
  0x91   :  { %1265 = vmatprep.subr.bf16.mxu1 %v1656_v0  ;;  %v1405_v11 = vld [vmem:[%s2056_s20 + $0x30] sm:$0xff]   ;;  %v1406_v12 = vld [vmem:[%s2056_s20 + $0x38] sm:$0xff]   ;;  %v1126_v17 = vld [vmem:[%s2057_s21] ss:$0 sm:$0xff] }
  0x92   :  { %v1418_v45 = vld [vmem:[#allocation7 + $0x10] ss:$8 sps:$4 sm:$0xff]   ;;  %v1423_v46 = vld [vmem:[#allocation7 + $0x24] ss:$8 sps:$4 sm:$0xff]   ;;  %v1426_v48 = vld [vmem:[#allocation7 + $0x34] ss:$8 sps:$4 sm:$0xff]  }
  0x93   :  { %1262 = vmatmul.mubr.msk.bf16.vlgmr.msra.gmra.mrb[0].mxu1 %vm165_vm2, %v1879_v4  ;;  %1290 = vmatpush3.bf16.msra.mxu0 %v1409_v15  ;;  %v1424_v49 = vld [vmem:[#allocation7 + $0x30] ss:$8 sps:$4 sm:$0xff]   ;;  %v1429_v50 = vld [vmem:[#allocation7 + $0x44] ss:$8 sps:$4 sm:$0xff]   ;;  %v1432_v52 = vld [vmem:[#allocation7 + $0x54] ss:$8 sps:$4 sm:$0xff]  }
  0x94   :  { %1266 = vmatpush3.bf16.msra.mxu1 %v1399_v5  ;;  %1281 = vmatprep.mubr.msk.bf16.mxu1 %vm1657_vm0, %v1656_v0  ;;  %v1430_v53 = vld [vmem:[#allocation7 + $0x50] ss:$8 sps:$4 sm:$0xff]   ;;  %v1437_v54 = vld [vmem:[#allocation7 + $0x64] ss:$8 sps:$4 sm:$0xff]   ;;  %v1435_v55 = vld [vmem:[#allocation7 + $0x60] ss:$8 sps:$4 sm:$0xff]  }
  0x95   :  { %1267 = vmatprep.subr.bf16.mxu1 %v1656_v0  ;;  %1291 = vmatprep.subr.bf16.mxu0 %v1656_v0  ;;  %v1440_v56 = vld [vmem:[#allocation7 + $0x74] ss:$8 sps:$4 sm:$0xff]   ;;  %v1438_v57 = vld [vmem:[#allocation7 + $0x70] ss:$8 sps:$4 sm:$0xff]   ;;  %v1441_v60 = vld [vmem:[#allocation9] sm:$0xff]   ;;  %v634_v15 = vsub.s32 0, %v633_v14 }
  0x96   :  { %v154_v58 = vld [vmem:[#allocation2] sm:$0xff]  ;;  %v1445_v1 = vld [vmem:[#allocation9 + $0x20] sm:$0xff]  }
  0x97   :  { %1292 = vmatpush3.bf16.msra.mxu0 %v1410_v16  ;;  %v439_v59 = vpack.c.bf16 %v154_v58, %v154_v58  ;;  %v1442_v61 = vld [vmem:[#allocation9 + $0x8] sm:$0xff]   ;;  %v1443_v62 = vld [vmem:[#allocation9 + $0x10] sm:$0xff]  }
  0x98   :  { %1268 = vmatpush3.bf16.msra.mxu1 %v1400_v6  ;;  %1293 = vmatprep.subr.bf16.mxu0 %v1656_v0  ;;  %v1446_v5 = vld [vmem:[#allocation9 + $0x28] sm:$0xff]  }
  0x99   :  { %1269 = vmatprep.subr.bf16.mxu1 %v1656_v0  ;;  %v630_v16 = vld [vmem:[%s2037_s9] sm:$0x3] }
  0x9b   :  { %1294 = vmatpush3.bf16.msra.mxu0 %v1411_v25 }
  0x9c   :  { %1270 = vmatpush3.bf16.msra.mxu1 %v1401_v7  ;;  %1295 = vmatprep.subr.bf16.mxu0 %v1656_v0  ;;  %v1447_v7 = vld [vmem:[#allocation9 + $0x30] sm:$0xff]  }
  0x9d   :  { %1271 = vmatprep.subr.bf16.mxu1 %v1656_v0 }
  0x9f   :  { %1296 = vmatpush3.bf16.msra.mxu0 %v1412_v26 }
  0xa0   :  { %1272 = vmatpush3.bf16.msra.mxu1 %v1402_v8  ;;  %1297 = vmatprep.subr.bf16.mxu0 %v1656_v0  ;;  %v1448_v8 = vld [vmem:[#allocation9 + $0x38] sm:$0xff]  }
  0xa1   :  { %1273 = vmatprep.subr.bf16.mxu1 %v1656_v0 }
  0xa3   :  { %1298 = vmatpush3.bf16.msra.mxu0 %v1413_v27 }
  0xa4   :  { %1274 = vmatpush3.bf16.msra.mxu1 %v1403_v9  ;;  %1299 = vmatprep.subr.bf16.mxu0 %v1656_v0 }
  0xa5   :  { %1275 = vmatprep.subr.bf16.mxu1 %v1656_v0 }
  0xa7   :  { %1300 = vmatpush3.bf16.msra.mxu0 %v1414_v28 }
  0xa8   :  { %1276 = vmatpush3.bf16.msra.mxu1 %v1404_v10  ;;  %589 = vmatprep.subr.bf16.mxu0 %v1417_v29 }
  0xa9   :  { %1277 = vmatprep.subr.bf16.mxu1 %v1656_v0 }
  0xac   :  { %1278 = vmatpush3.bf16.msra.mxu1 %v1405_v11 }
  0xad   :  { %1279 = vmatprep.subr.bf16.mxu1 %v1656_v0 }
  0xb0   :  { %1280 = vmatpush3.bf16.msra.mxu1 %v1406_v12 }
  0xb1   :  { %1148 = vmatprep.subr.msk.bf16.mxu1 %vm169_vm1, %v1147_v31 }
 0x166   :  { %v207_v18 = vpop.f32.mrb[0].mxu1 }
 0x167   :  { %v208_v19 = vadd.f32 %v1126_v17, %v207_v18  ;;  %v1263_v20 = vpop.f32.mrb[1].mxu1  ;;  %v638_v17 = vsub.s32 1, %v633_v14  ;;  %v635_v18 = vrot.slane %v630_v16, %v634_v15  ;;  %v1469_v14 = vld [vmem:[%s2044_s16 + $0x20] sm:$0xff]   ;;  %v1470_v15 = vld [vmem:[%s2044_s16 + $0x28] sm:$0xff]  }
 0x168   :  { %v210_v21 = vpop.f32.mrb[2].mxu1 }
 0x169   :  { %v213_v22 = vpack.c.bf16 %v208_v19, %v208_v19  ;;  %v1264_v23 = vpop.f32.mrb[3].mxu1  ;;  %v639_v20 = vrot.slane %v630_v16, %v638_v17  ;;  %v1471_v16 = vld [vmem:[%s2044_s16 + $0x30] sm:$0xff]   ;;  %v1472_v17 = vld [vmem:[%s2044_s16 + $0x38] sm:$0xff]  }
 0x16b   :  { %1473 = vtanh.bf16 %v213_v22 }
 0x176   :  { %v1474_v24 = vpop.eup %1473 }
 0x177   :  { %1282 = vmatmul.mubr.bf16.vlgmr.msra.gmra.mrb[4].mxu1 %v1474_v24 }
 0x178   :  { %469 = vmatpush1.bf16.msra.mxu1 %v463_v33  ;;  %500 = vmatprep.mubr.bf16.mxu1 %v1658_v34  ;;  %v1193_v33 = vld [vmem:[%s2046_s18] ss:$0 sm:$0xff] }
 0x179   :  { %1305 = vmatprep.subr.bf16.mxu1 %v1656_v0 }
 0x17f   :  { %1149 = vmatmul.mubr.msk.bf16.vlgmr.msra.gmra.mrb[8].mxu1 %vm165_vm2, %v1879_v4 }
 0x180   :  { %1321 = vmatprep.mubr.msk.bf16.mxu1 %vm1657_vm0, %v1656_v0  ;;  %1306 = vmatpush3.bf16.msra.mxu1 %v1441_v60  ;;  %v1461_v60 = vld [vmem:[#allocation12 + $0x20] sm:$0xff]  }
 0x181   :  { %1307 = vmatprep.subr.bf16.mxu1 %v1656_v0 }
 0x184   :  { %1308 = vmatpush3.bf16.msra.mxu1 %v1442_v61  ;;  %v1462_v61 = vld [vmem:[#allocation12 + $0x28] sm:$0xff]  }
 0x185   :  { %1309 = vmatprep.subr.bf16.mxu1 %v1656_v0 }
 0x188   :  { %1310 = vmatpush3.bf16.msra.mxu1 %v1443_v62  ;;  %v1463_v62 = vld [vmem:[#allocation12 + $0x30] sm:$0xff]  }
 0x189   :  { %1311 = vmatprep.subr.bf16.mxu1 %v1656_v0 }
 0x18c   :  { %1312 = vmatpush3.bf16.msra.mxu1 %v1444_v63  ;;  %v1464_v63 = vld [vmem:[#allocation12 + $0x38] sm:$0xff]  }
 0x18d   :  { %1313 = vmatprep.subr.bf16.mxu1 %v1656_v0 }
 0x190   :  { %1314 = vmatpush3.bf16.msra.mxu1 %v1445_v1  ;;  %v1465_v1 = vld [vmem:[%s2044_s16] sm:$0xff]  }
 0x191   :  { %1315 = vmatprep.subr.bf16.mxu1 %v1656_v0 }
 0x194   :  { %1316 = vmatpush3.bf16.msra.mxu1 %v1446_v5  ;;  %v1175_v5 = vld [vmem:[%s2041_s13] ss:$0 sm:$0xff] }
 0x195   :  { %1317 = vmatprep.subr.bf16.mxu1 %v1656_v0 }
 0x198   :  { %1318 = vmatpush3.bf16.msra.mxu1 %v1447_v7 }
 0x199   :  { %1319 = vmatprep.subr.bf16.mxu1 %v1656_v0 }
 0x19c   :  { %1320 = vmatpush3.bf16.msra.mxu1 %v1448_v8 }
 0x19d   :  { %1345 = vmatprep.subr.bf16.mxu1 %v1656_v0 }
 0x24a   :  { %v320_v36 = vpop.f32.mrb[4].mxu1 }
 0x24b   :  { %v321_v37 = vadd.f32 %v1128_v35, %v320_v36  ;;  %v1283_v38 = vpop.f32.mrb[5].mxu1  ;;  %v1449_v36 = vld [vmem:[#allocation10] sm:$0xff]  }
 0x24c   :  { %v323_v39 = vpop.f32.mrb[6].mxu1  ;;  %v1451_v38 = vld [vmem:[#allocation10 + $0x10] sm:$0xff]  }
 0x24d   :  { %v326_v40 = vpack.c.bf16 %v321_v37, %v321_v37  ;;  %v1284_v41 = vpop.f32.mrb[7].mxu1  ;;  %v1450_v37 = vld [vmem:[#allocation10 + $0x8] sm:$0xff]   ;;  %v1452_v39 = vld [vmem:[#allocation10 + $0x18] sm:$0xff]  }
 0x24e   :  { %v1454_v41 = vld [vmem:[#allocation10 + $0x28] sm:$0xff]  }
 0x24f   :  { %1475 = vtanh.bf16 %v326_v40  ;;  %v1453_v40 = vld [vmem:[#allocation10 + $0x20] sm:$0xff]  }
 0x252   :  { %v502_v2 = vpop.f32.mrb[8].mxu1 }
 0x253   :  { %v504_v3 = vpop.f32.mrb[9].mxu1 }
 0x254   :  { %v506_v4 = vpop.f32.mrb[10].mxu1 }
 0x255   :  { %v507_v6 = vpop.f32.mrb[11].mxu1  ;;  %v1468_v4 = vld [vmem:[%s2044_s16 + $0x18] sm:$0xff]  }
 0x25a   :  { %v1476_v44 = vpop.eup %1475 }
 0x25b   :  { %1302 = vmatmul.mubr.bf16.vlgmr.msra.gmra.mrb[0].mxu0 %v1476_v44  ;;  %v1457_v44 = vld [vmem:[#allocation12] sm:$0xff]  }
 0x25c   :  { %590 = vmatpush1.bf16.msra.mxu0 %v1415_v42  ;;  %621 = vmatprep.mubr.bf16.mxu0 %v1658_v34  ;;  %v1455_v42 = vld [vmem:[#allocation10 + $0x30] sm:$0xff]  }
 0x25d   :  { %591 = vmatprep.subr.bf16.mxu0 %v1420_v43  ;;  %v1456_v43 = vld [vmem:[#allocation10 + $0x38] sm:$0xff]  }
 0x260   :  { %592 = vmatpush1.bf16.msra.mxu0 %v1418_v45  ;;  %v1458_v45 = vld [vmem:[#allocation12 + $0x8] sm:$0xff]  }
 0x261   :  { %593 = vmatprep.subr.bf16.mxu0 %v1423_v46  ;;  %v1459_v46 = vld [vmem:[#allocation12 + $0x10] sm:$0xff]  }
 0x264   :  { %594 = vmatpush1.bf16.msra.mxu0 %v1421_v47  ;;  %v1460_v47 = vld [vmem:[#allocation12 + $0x18] sm:$0xff]  }
 0x265   :  { %595 = vmatprep.subr.bf16.mxu0 %v1426_v48  ;;  %v1166_v48 = vld [vmem:[%s2039_s11] ss:$0 sm:$0xff] }
 0x268   :  { %596 = vmatpush1.bf16.msra.mxu0 %v1424_v49 }
 0x269   :  { %597 = vmatprep.subr.bf16.mxu0 %v1429_v50 }
 0x26c   :  { %598 = vmatpush1.bf16.msra.mxu0 %v1427_v51 }
 0x26d   :  { %599 = vmatprep.subr.bf16.mxu0 %v1432_v52  ;;  %v1137_v52 = vld [vmem:[%s2034_s6] ss:$0 sm:$0xff] }
 0x270   :  { %600 = vmatpush1.bf16.msra.mxu0 %v1430_v53 }
 0x271   :  { %601 = vmatprep.subr.bf16.mxu0 %v1437_v54 }
 0x274   :  { %602 = vmatpush1.bf16.msra.mxu0 %v1435_v55 }
 0x275   :  { %603 = vmatprep.subr.bf16.mxu0 %v1440_v56 }
 0x278   :  { %604 = vmatpush1.bf16.msra.mxu0 %v1438_v57 }
 0x279   :  { %1325 = vmatprep.subr.bf16.mxu0 %v1656_v0 }
 0x27b   :  { %622 = vmatmul.mubr.bf16.vlgmr.msra.gmra.mrb[4].mxu0 %v439_v59 }
 0x27c   :  { %1341 = vmatprep.mubr.msk.bf16.mxu0 %vm1657_vm0, %v1656_v0  ;;  %1326 = vmatpush3.bf16.msra.mxu0 %v1449_v36 }
 0x27d   :  { %1327 = vmatprep.subr.bf16.mxu0 %v1656_v0 }
 0x280   :  { %1328 = vmatpush3.bf16.msra.mxu0 %v1450_v37 }
 0x281   :  { %1329 = vmatprep.subr.bf16.mxu0 %v1656_v0 }
 0x284   :  { %1330 = vmatpush3.bf16.msra.mxu0 %v1451_v38 }
 0x285   :  { %1331 = vmatprep.subr.bf16.mxu0 %v1656_v0 }
 0x288   :  { %1332 = vmatpush3.bf16.msra.mxu0 %v1452_v39 }
 0x289   :  { %1333 = vmatprep.subr.bf16.mxu0 %v1656_v0 }
 0x28c   :  { %1334 = vmatpush3.bf16.msra.mxu0 %v1453_v40 }
 0x28d   :  { %1335 = vmatprep.subr.bf16.mxu0 %v1656_v0 }
 0x290   :  { %1336 = vmatpush3.bf16.msra.mxu0 %v1454_v41 }
 0x291   :  { %1337 = vmatprep.subr.bf16.mxu0 %v1656_v0 }
 0x294   :  { %1338 = vmatpush3.bf16.msra.mxu0 %v1455_v42 }
 0x295   :  { %1339 = vmatprep.subr.bf16.mxu0 %v1656_v0 }
 0x298   :  { %1340 = vmatpush3.bf16.msra.mxu0 %v1456_v43 }
 0x299   :  { %1365 = vmatprep.subr.bf16.mxu0 %v1656_v0 }
 0x32e   :  { %v1948_v9 = vpop.f32.mrb[0].mxu0 }
 0x32f   :  { %v1303_v10 = vpop.f32.mrb[1].mxu0  ;;  %v434_v56 = vadd.f32 %v1137_v52, %v1948_v9 }
 0x330   :  { %v436_v11 = vpop.f32.mrb[2].mxu0 }
 0x331   :  { %v1304_v12 = vpop.f32.mrb[3].mxu0 }
 0x34e   :  { %v623_v19 = vpop.f32.mrb[4].mxu0 }
 0x34f   :  { %v624_v21 = vadd.f32 %v623_v19, %v502_v2  ;;  %v625_v22 = vpop.f32.mrb[5].mxu0  ;;  %v1466_v2 = vld [vmem:[%s2044_s16 + $0x8] sm:$0xff]  }
 0x350   :  { %v626_v23 = vadd.f32 %v625_v22, %v504_v3  ;;  %v627_v24 = vpop.f32.mrb[6].mxu0  ;;  %v1467_v3 = vld [vmem:[%s2044_s16 + $0x10] sm:$0xff]  }
 0x351   :  { %v642_v25 = vadd.f32 %v635_v18, %v624_v21  ;;  %v628_v26 = vpop.f32.mrb[7].mxu0  ;;  %v1184_v18 = vld [vmem:[%s2043_s15] ss:$0 sm:$0xff] }
 0x352   :  { %v643_v27 = vadd.f32 %v639_v20, %v626_v23  ;;  %v1113_v26 = vand.u32 127, %v632_v13 }
 0x353   :  { %v644_v28 = vmul.f32 0.01, %v642_v25 }
 0x354   :  { %v988_v29 = vpack.c.bf16 %v643_v27, %v643_v27  ;;  %vm1114_vm3 = vcmp.eq.s32.totalorder %v1113_v26, 4 }
 0x355   :  { %v645_v30 = vmax.f32 %v642_v25, %v644_v28 }
 0x356   :  { %1477 = vtanh.bf16 %v988_v29 }
 0x357   :  { %v646_v31 = vpack.c.bf16 %v645_v30, %v645_v30 }
 0x359   :  { %1322 = vmatmul.mubr.bf16.vlgmr.msra.gmra.mrb[12].mxu1 %v646_v31 }
 0x35a   :  { %1361 = vmatprep.mubr.msk.bf16.mxu1 %vm1657_vm0, %v1656_v0  ;;  %1346 = vmatpush3.bf16.msra.mxu1 %v1457_v44 }
 0x35b   :  { %1347 = vmatprep.subr.bf16.mxu1 %v1656_v0 }
 0x35e   :  { %1348 = vmatpush3.bf16.msra.mxu1 %v1458_v45 }
 0x35f   :  { %1349 = vmatprep.subr.bf16.mxu1 %v1656_v0 }
 0x361   :  { %v1478_v32 = vpop.eup %1477 }
 0x362   :  { %v990_v34 = vunpack.c.l.bf16 %v1478_v32  ;;  %1350 = vmatpush3.bf16.msra.mxu1 %v1459_v46 }
 0x363   :  { %1351 = vmatprep.subr.bf16.mxu1 %v1656_v0 }
 0x364   :  { %v998_v35 = vmul.f32 %v1193_v33, %v990_v34 }
 0x366   :  { %999 = vadd.xlane.f32.xlu0 %v998_v35  ;;  %1352 = vmatpush3.bf16.msra.mxu1 %v1460_v47 }
 0x367   :  { %1353 = vmatprep.subr.bf16.mxu1 %v1656_v0 }
 0x36a   :  { %1354 = vmatpush3.bf16.msra.mxu1 %v1461_v60 }
 0x36b   :  { %1355 = vmatprep.subr.bf16.mxu1 %v1656_v0 }
 0x36e   :  { %1356 = vmatpush3.bf16.msra.mxu1 %v1462_v61 }
 0x36f   :  { %1357 = vmatprep.subr.bf16.mxu1 %v1656_v0 }
 0x372   :  { %1358 = vmatpush3.bf16.msra.mxu1 %v1463_v62 }
 0x373   :  { %1359 = vmatprep.subr.bf16.mxu1 %v1656_v0 }
 0x376   :  { %1360 = vmatpush3.bf16.msra.mxu1 %v1464_v63 }
 0x3f3   :  { %v1000_v27 = vpop.xlane.xlu0 %999 }
 0x3f4   :  { %v1115_v31 = vsel %vm1114_vm3, %v1000_v27, 0.0 }
 0x42c   :  { %v752_v49 = vpop.f32.mrb[12].mxu1 }
 0x42d   :  { %v753_v50 = vadd.f32 %v1166_v48, %v752_v49  ;;  %v1323_v51 = vpop.f32.mrb[13].mxu1 }
 0x42e   :  { %v755_v53 = vpop.f32.mrb[14].mxu1 }
 0x42f   :  { %v758_v54 = vmul.f32 0.01, %v753_v50  ;;  %v1324_v55 = vpop.f32.mrb[15].mxu1 }
 0x431   :  { %v759_v57 = vmax.f32 %v753_v50, %v758_v54 }
 0x433   :  { %v760_v58 = vadd.f32 %v759_v57, %v434_v56 }
 0x435   :  { %v761_v59 = vpack.c.bf16 %v760_v58, %v760_v58 }
 0x437   :  { %1342 = vmatmul.mubr.bf16.vlgmr.msra.gmra.mrb[8].mxu0 %v761_v59 }
 0x438   :  { %1381 = vmatprep.mubr.msk.bf16.mxu0 %vm1657_vm0, %v1656_v0  ;;  %1366 = vmatpush3.bf16.msra.mxu0 %v1465_v1 }
 0x439   :  { %1367 = vmatprep.subr.bf16.mxu0 %v1656_v0 }
 0x43c   :  { %1368 = vmatpush3.bf16.msra.mxu0 %v1466_v2 }
 0x43d   :  { %1369 = vmatprep.subr.bf16.mxu0 %v1656_v0 }
 0x440   :  { %1370 = vmatpush3.bf16.msra.mxu0 %v1467_v3 }
 0x441   :  { %1371 = vmatprep.subr.bf16.mxu0 %v1656_v0 }
 0x444   :  { %1372 = vmatpush3.bf16.msra.mxu0 %v1468_v4 }
 0x445   :  { %1373 = vmatprep.subr.bf16.mxu0 %v1656_v0 }
 0x448   :  { %1374 = vmatpush3.bf16.msra.mxu0 %v1469_v14 }
 0x449   :  { %1375 = vmatprep.subr.bf16.mxu0 %v1656_v0 }
 0x44c   :  { %1376 = vmatpush3.bf16.msra.mxu0 %v1470_v15 }
 0x44d   :  { %1377 = vmatprep.subr.bf16.mxu0 %v1656_v0 }
 0x450   :  { %1378 = vmatpush3.bf16.msra.mxu0 %v1471_v16 }
 0x451   :  { %1379 = vmatprep.subr.bf16.mxu0 %v1656_v0  ;;  %v1194_v0 = vld [vmem:[%s2045_s17] ss:$0 sm:$0xff] }
 0x454   :  { %1380 = vmatpush3.bf16.msra.mxu0 %v1472_v17 }
 0x50a   :  { %v867_v6 = vpop.f32.mrb[8].mxu0 }
 0x50b   :  { %v868_v7 = vadd.f32 %v1175_v5, %v867_v6  ;;  %v1343_v8 = vpop.f32.mrb[9].mxu0 }
 0x50c   :  { %v870_v9 = vpop.f32.mrb[10].mxu0 }
 0x50d   :  { %v873_v10 = vpack.c.bf16 %v868_v7, %v868_v7  ;;  %v1344_v11 = vpop.f32.mrb[11].mxu0 }
 0x50f   :  { %1479 = vtanh.bf16 %v873_v10 }
 0x51a   :  { %v1480_v12 = vpop.eup %1479 }
 0x51b   :  { %1362 = vmatmul.mubr.bf16.vlgmr.msra.gmra.mrb[16].mxu1 %v1480_v12 }
 0x5ee   :  { %v980_v19 = vpop.f32.mrb[16].mxu1 }
 0x5ef   :  { %v981_v20 = vadd.f32 %v1184_v18, %v980_v19  ;;  %v1363_v21 = vpop.f32.mrb[17].mxu1 }
 0x5f0   :  { %v983_v22 = vpop.f32.mrb[18].mxu1 }
 0x5f1   :  { %v986_v23 = vpack.c.bf16 %v981_v20, %v981_v20  ;;  %v1364_v24 = vpop.f32.mrb[19].mxu1 }
 0x5f3   :  { %1481 = vtanh.bf16 %v986_v23 }
 0x5fe   :  { %v1482_v25 = vpop.eup %1481 }
 0x5ff   :  { %1382 = vmatmul.mubr.bf16.vlgmr.msra.gmra.mrb[12].mxu0 %v1482_v25 }
 0x6d2   :  { %v1106_v28 = vpop.f32.mrb[12].mxu0 }
 0x6d3   :  { %v1107_v29 = vadd.f32 %v1194_v0, %v1106_v28  ;;  %v1383_v30 = vpop.f32.mrb[13].mxu0 }
 0x6d4   :  { %v1109_v32 = vpop.f32.mrb[14].mxu0 }
 0x6d5   :  { %v1116_v33 = vadd.f32 %v1115_v31, %v1107_v29  ;;  %v1384_v34 = vpop.f32.mrb[15].mxu0 }
 0x6d7   :  { %1117 = vst.msk [vmem:[%s2047_s19] sm:$0xff] %vm165_vm2, %v1116_v33 }
 0x6d8   :  { %1122 = vsyncpa [#allocation3], 1 }
 0x6d9   :  { %1123 = vsyncpa [#allocation5], 1 }
 0x6da   :  { %1124 = vsyncpa [#allocation8], 1 }
 0x6db   :  { %1125 = vsyncpa [#allocation11], 1 }

</bundles_post_ra>
